<compile_context>
chip_gen: v5e
topology: v5e:2x2
jax: 0.10.0
libtpu: 0.0.40
codegen_flags: <defaults>
</compile_context>

<pallas_src>
import math

import jax
import jax.numpy as jnp
from jax.experimental import pallas as pl
from jax.experimental.pallas import tpu as pltpu

# ---- static configuration (small synthetic shapes) ----
B = 2            # batch
T = 8            # sequence length (attention dim = 0)
QUERY = 32       # query_size
KEY = 32         # key_size
VALUE = 32       # value_size
H = 4            # num_heads
DQ = 8           # single-head query size (d_q)
DK = 8           # single-head key size   (d_k)
DV = VALUE // H  # d_v = max(1, value_size // num_heads) = 8
OUT = VALUE      # out_size defaults to value_size

assert DQ == DK, "dot-product single-head attention requires d_q == d_k"
assert H * DV == VALUE and OUT == VALUE

# MXU operand dtype (accumulation stays f32 via preferred_element_type);
# element-wise softmax math is kept in f32 on every TPU generation.
MXU_DTYPE = jnp.bfloat16


def mha_kernel(lens_ref, q_ref, k_ref, v_ref, wq_ref, wk_ref, wv_ref, wc_ref,
               group_ref, expand_ref, out_ref):
    # --- fused Q/K/V projections: bf16 operands, f32 accumulation on the MXU ---
    qh = jnp.dot(q_ref[...], wq_ref[...],
                 preferred_element_type=jnp.float32)                  # (B, H*DQ)
    kh = jnp.dot(k_ref[...], wk_ref[...],
                 preferred_element_type=jnp.float32)                  # (T*B, H*DK)
    vh = jnp.dot(v_ref[...], wv_ref[...],
                 preferred_element_type=jnp.float32)                  # (T*B, H*DV)
    kh = kh.reshape(T, B, H * DK)   # split leading dim only (layout no-op)
    vh = vh.reshape(T, B, H * DV)

    # --- per-head scores, all heads at once ------------------------------------
    # e[t,b,h] = (1/sqrt(DK)) * sum_d qh[b,h*DK+d] * kh[t,b,h*DK+d]
    # The 1/sqrt(DK) scale is pre-folded into `group` (built in the wrapper).
    # Head reduction runs on the MXU against the static block-select matrix;
    # this contraction is kept in f32 (it is effectively a masked reduce).
    qk = kh * qh[None, :, :]                                          # (T, B, H*DK)
    e = jax.lax.dot_general(qk, group_ref[...], (((2,), (0,)), ((), ())),
                            preferred_element_type=jnp.float32)       # (T, B, H)

    # --- masked softmax over the sequence axis (T = axis 0), all in f32 --------
    # keep[t,b] = t < lens[b]; lens arrives pre-shaped (1,B,1) so this is one
    # vectorized compare (no per-batch scalar loop).
    t_iota = jax.lax.broadcasted_iota(jnp.int32, (T, B, 1), 0)
    keep = t_iota < lens_ref[...]                                     # (T, B, 1)
    e = jnp.where(keep, e, -1e30)   # finite fill -> no NaN if a row is all-masked

    m = jnp.max(e, axis=0, keepdims=True)
    p = jnp.exp(e - m)
    denom = jnp.sum(p, axis=0, keepdims=True)
    a = p * pl.reciprocal(denom, approx=True)                         # (T, B, H)

    # --- weighted value sum for all heads at once -------------------------------
    # heads[b, h*DV+dv] = sum_t a[t,b,h] * vh[t,b,h*DV+dv]
    # Head expansion on the MXU (bf16 probs, exact 0/1 expand matrix), then an
    # outer-dim accumulation over T (cheap vreg adds in (T,B,.) layout).
    a_exp = jax.lax.dot_general(a.astype(MXU_DTYPE), expand_ref[...],
                                (((2,), (0,)), ((), ())),
                                preferred_element_type=jnp.float32)   # (T, B, H*DV)
    heads = jnp.sum(a_exp * vh, axis=0)                               # (B, H*DV)

    # --- output projection -------------------------------------------------------
    out_ref[...] = jnp.dot(heads.astype(MXU_DTYPE), wc_ref[...],
                           preferred_element_type=jnp.float32).astype(out_ref.dtype)


@jax.jit
def mha_forward(query, key, value, lens, wq, wk, wv, wc):
    # (T,B,D) -> (T*B,D) is a pure view (row = t*B + b): no transpose, so K/V are
    # not pushed through HBM an extra time before the kernel.
    q2d = query.astype(MXU_DTYPE)
    k2d = key.reshape(T * B, KEY).astype(MXU_DTYPE)
    v2d = value.reshape(T * B, VALUE).astype(MXU_DTYPE)

    # Static head-grouping / head-expansion select matrices, hoisted out of the
    # kernel body.  The 1/sqrt(DK) score scale is folded into `group` for free.
    col_head_k = jnp.arange(H * DK, dtype=jnp.int32) // DK
    group = (col_head_k[:, None] == jnp.arange(H, dtype=jnp.int32)[None, :])
    group = group.astype(jnp.float32) * (1.0 / math.sqrt(DK))         # (H*DK, H)
    col_head_v = jnp.arange(H * DV, dtype=jnp.int32) // DV
    expand = (jnp.arange(H, dtype=jnp.int32)[:, None] == col_head_v[None, :])
    expand = expand.astype(MXU_DTYPE)                                 # (H, H*DV)

    lens3 = lens.astype(jnp.int32).reshape(1, B, 1)

    vmem = pl.BlockSpec(memory_space=pltpu.MemorySpace.VMEM)

    # TODO(synk): production path (large T/B): flash-style grid over
    # (batch "parallel", T "arbitrary") with online-softmax accumulators,
    # lane-dense score tiles fed to an MXU `acc += p @ v_tile`, K/V tiles >=512
    # rows on v5e/v6e and re-derived against v7x's 64 MiB VMEM
    # (vmem_limit_bytes set explicitly), and lens via PrefetchScalarGridSpec
    # (num_scalar_prefetch=1) to skip fully-padded K/V tiles.
    return pl.pallas_call(
        mha_kernel,
        out_shape=jax.ShapeDtypeStruct((B, OUT), jnp.float32),
        in_specs=[vmem] * 10,
        out_specs=vmem,
    )(lens3, q2d, k2d, v2d,
      wq.astype(MXU_DTYPE), wk.astype(MXU_DTYPE),
      wv.astype(MXU_DTYPE), wc.astype(MXU_DTYPE),
      group, expand)


def mha_reference(query, key, value, lens, wq, wk, wv, wc):
    """Pure-JAX f32 mirror of the PyTorch forward (for verification)."""
    qh = (query @ wq).reshape(B, H, DQ)
    kh = (key @ wk).reshape(T, B, H, DK)
    vh = (value @ wv).reshape(T, B, H, DV)
    e = jnp.sum(qh[None] * kh, axis=-1) / math.sqrt(DK)          # (T, B, H)
    mask = jnp.arange(T)[:, None] < lens[None, :]                # (T, B)
    e = jnp.where(mask[:, :, None], e, -jnp.inf)
    a = jax.nn.softmax(e, axis=0)
    heads = jnp.sum(a[..., None] * vh, axis=0)                   # (B, H, DV)
    return heads.reshape(B, H * DV) @ wc


def _linear_weight(key, fan_in, fan_out):
    # torch.nn.Linear default init U(-1/sqrt(fan_in), 1/sqrt(fan_in)),
    # stored as (in, out) so the kernel applies y = x @ W (bias=False).
    bound = 1.0 / math.sqrt(fan_in)
    return jax.random.uniform(key, (fan_in, fan_out), jnp.float32, -bound, bound)


if __name__ == "__main__":
    root = jax.random.PRNGKey(0)
    kq, kk, kv, kwq, kwk, kwv, kwc = jax.random.split(root, 7)

    query = jax.random.normal(kq, (B, QUERY), jnp.float32)
    key = jax.random.normal(kk, (T, B, KEY), jnp.float32)
    value = jax.random.normal(kv, (T, B, VALUE), jnp.float32)

    # variable-length mask: batch 0 sees all T steps, batch 1 sees 5
    lens = jnp.array([T, 5], dtype=jnp.int32)

    wq = _linear_weight(kwq, QUERY, H * DQ)
    wk = _linear_weight(kwk, KEY, H * DK)
    wv = _linear_weight(kwv, VALUE, H * DV)
    wc = _linear_weight(kwc, H * DV, OUT)

    out = mha_forward(query, key, value, lens, wq, wk, wv, wc)
    out = jax.block_until_ready(out)

    ref = mha_reference(query, key, value, lens, wq, wk, wv, wc)
    assert out.shape == (B, OUT)
    # Tolerance covers bf16 MXU-operand rounding (f32 accumulation) against the
    # pure-f32 reference plus pl.reciprocal(approx=True) in the softmax divide.
    assert jnp.allclose(out, ref, rtol=2e-2, atol=2e-2), (out, ref)

    print("KERNEL_OK")
</pallas_src>

<mosaic_0001>
module attributes {stable_mosaic.version = 11 : i64} {
  func.func @mha_kernel(%arg0: memref<1x2x1xi32, #tpu.memory_space<vmem>>, %arg1: memref<2x32xbf16, #tpu.memory_space<vmem>>, %arg2: memref<16x32xbf16, #tpu.memory_space<vmem>>, %arg3: memref<16x32xbf16, #tpu.memory_space<vmem>>, %arg4: memref<32x32xbf16, #tpu.memory_space<vmem>>, %arg5: memref<32x32xbf16, #tpu.memory_space<vmem>>, %arg6: memref<32x32xbf16, #tpu.memory_space<vmem>>, %arg7: memref<32x32xbf16, #tpu.memory_space<vmem>>, %arg8: memref<32x4xf32, #tpu.memory_space<vmem>>, %arg9: memref<4x32xbf16, #tpu.memory_space<vmem>>, %arg10: memref<2x32xf32, #tpu.memory_space<vmem>>) attributes {dimension_semantics = [], scalar_prefetch = 0 : i64, scratch_operands = 0 : i64, tpu.core_type = #tpu.core_type<tc>} {
    %c0 = arith.constant 0 : index
    %c0_0 = arith.constant 0 : index
    %0 = vector.load %arg1[%c0, %c0_0] : memref<2x32xbf16, #tpu.memory_space<vmem>>, vector<2x32xbf16>
    %c0_1 = arith.constant 0 : index
    %c0_2 = arith.constant 0 : index
    %1 = vector.load %arg4[%c0_1, %c0_2] : memref<32x32xbf16, #tpu.memory_space<vmem>>, vector<32x32xbf16>
    %cst = arith.constant dense<0.000000e+00> : vector<2x32xf32>
    %2 = tpu.matmul %0, %1, %cst {dimension_numbers = #tpu.dot_dimension_numbers<[1], [0], [0], [1], [0, 0, 1, 1], [], []>} : vector<2x32xbf16>, vector<32x32xbf16>, vector<2x32xf32> -> vector<2x32xf32>
    %c0_3 = arith.constant 0 : index
    %c0_4 = arith.constant 0 : index
    %3 = vector.load %arg2[%c0_3, %c0_4] : memref<16x32xbf16, #tpu.memory_space<vmem>>, vector<16x32xbf16>
    %c0_5 = arith.constant 0 : index
    %c0_6 = arith.constant 0 : index
    %4 = vector.load %arg5[%c0_5, %c0_6] : memref<32x32xbf16, #tpu.memory_space<vmem>>, vector<32x32xbf16>
    %cst_7 = arith.constant dense<0.000000e+00> : vector<16x32xf32>
    %5 = tpu.matmul %3, %4, %cst_7 {dimension_numbers = #tpu.dot_dimension_numbers<[1], [0], [0], [1], [0, 0, 1, 1], [], []>} : vector<16x32xbf16>, vector<32x32xbf16>, vector<16x32xf32> -> vector<16x32xf32>
    %c0_8 = arith.constant 0 : index
    %c0_9 = arith.constant 0 : index
    %6 = vector.load %arg3[%c0_8, %c0_9] : memref<16x32xbf16, #tpu.memory_space<vmem>>, vector<16x32xbf16>
    %c0_10 = arith.constant 0 : index
    %c0_11 = arith.constant 0 : index
    %7 = vector.load %arg6[%c0_10, %c0_11] : memref<32x32xbf16, #tpu.memory_space<vmem>>, vector<32x32xbf16>
    %cst_12 = arith.constant dense<0.000000e+00> : vector<16x32xf32>
    %8 = tpu.matmul %6, %7, %cst_12 {dimension_numbers = #tpu.dot_dimension_numbers<[1], [0], [0], [1], [0, 0, 1, 1], [], []>} : vector<16x32xbf16>, vector<32x32xbf16>, vector<16x32xf32> -> vector<16x32xf32>
    %9 = vector.shape_cast %5 : vector<16x32xf32> to vector<8x2x32xf32>
    %10 = vector.shape_cast %8 : vector<16x32xf32> to vector<8x2x32xf32>
    %11 = vector.shape_cast %2 : vector<2x32xf32> to vector<1x2x32xf32>
    %12 = vector.broadcast %11 : vector<1x2x32xf32> to vector<8x2x32xf32>
    %13 = arith.mulf %9, %12 : vector<8x2x32xf32>
    %c0_13 = arith.constant 0 : index
    %c0_14 = arith.constant 0 : index
    %14 = vector.load %arg8[%c0_13, %c0_14] : memref<32x4xf32, #tpu.memory_space<vmem>>, vector<32x4xf32>
    %cst_15 = arith.constant dense<0.000000e+00> : vector<8x2x4xf32>
    %15 = tpu.matmul %13, %14, %cst_15 {dimension_numbers = #tpu.dot_dimension_numbers<[2], [0], [0, 1], [1], [0, 0, 0, 1, 1, 1], [], []>} : vector<8x2x32xf32>, vector<32x4xf32>, vector<8x2x4xf32> -> vector<8x2x4xf32>
    %16 = tpu.iota {dimensions = array<i32: 0>} : vector<8x2x1xi32>
    %c0_16 = arith.constant 0 : index
    %c0_17 = arith.constant 0 : index
    %c0_18 = arith.constant 0 : index
    %17 = vector.load %arg0[%c0_16, %c0_17, %c0_18] : memref<1x2x1xi32, #tpu.memory_space<vmem>>, vector<1x2x1xi32>
    %18 = vector.broadcast %17 : vector<1x2x1xi32> to vector<8x2x1xi32>
    %19 = arith.cmpi slt, %16, %18 : vector<8x2x1xi32>
    %cst_19 = arith.constant -1.000000e+30 : f32
    %20 = vector.shape_cast %19 : vector<8x2x1xi1> to vector<8x2x1xi1>
    %21 = vector.broadcast %20 : vector<8x2x1xi1> to vector<8x2x4xi1>
    %22 = vector.broadcast %cst_19 : f32 to vector<8x2x4xf32>
    %23 = arith.select %21, %15, %22 : vector<8x2x4xi1>, vector<8x2x4xf32>
    %cst_20 = arith.constant dense<0xFF800000> : vector<2x4xf32>
    %24 = vector.multi_reduction <maximumf>, %23, %cst_20 [0] : vector<8x2x4xf32> to vector<2x4xf32>
    %25 = vector.shape_cast %24 : vector<2x4xf32> to vector<1x2x4xf32>
    %26 = vector.broadcast %25 : vector<1x2x4xf32> to vector<8x2x4xf32>
    %27 = arith.subf %23, %26 : vector<8x2x4xf32>
    %28 = math.exp %27 : vector<8x2x4xf32>
    %cst_21 = arith.constant dense<0.000000e+00> : vector<2x4xf32>
    %29 = vector.multi_reduction <add>, %28, %cst_21 [0] : vector<8x2x4xf32> to vector<2x4xf32>
    %30 = vector.shape_cast %29 : vector<2x4xf32> to vector<1x2x4xf32>
    %31 = tpu.reciprocal %30 {approx = true} : vector<1x2x4xf32> -> vector<1x2x4xf32>
    %32 = vector.broadcast %31 : vector<1x2x4xf32> to vector<8x2x4xf32>
    %33 = arith.mulf %28, %32 : vector<8x2x4xf32>
    %34 = arith.truncf %33 : vector<8x2x4xf32> to vector<8x2x4xbf16>
    %c0_22 = arith.constant 0 : index
    %c0_23 = arith.constant 0 : index
    %35 = vector.load %arg9[%c0_22, %c0_23] : memref<4x32xbf16, #tpu.memory_space<vmem>>, vector<4x32xbf16>
    %cst_24 = arith.constant dense<0.000000e+00> : vector<8x2x32xf32>
    %36 = tpu.matmul %34, %35, %cst_24 {dimension_numbers = #tpu.dot_dimension_numbers<[2], [0], [0, 1], [1], [0, 0, 0, 1, 1, 1], [], []>} : vector<8x2x4xbf16>, vector<4x32xbf16>, vector<8x2x32xf32> -> vector<8x2x32xf32>
    %37 = arith.mulf %36, %10 : vector<8x2x32xf32>
    %cst_25 = arith.constant dense<0.000000e+00> : vector<2x32xf32>
    %38 = vector.multi_reduction <add>, %37, %cst_25 [0] : vector<8x2x32xf32> to vector<2x32xf32>
    %39 = arith.truncf %38 : vector<2x32xf32> to vector<2x32xbf16>
    %c0_26 = arith.constant 0 : index
    %c0_27 = arith.constant 0 : index
    %40 = vector.load %arg7[%c0_26, %c0_27] : memref<32x32xbf16, #tpu.memory_space<vmem>>, vector<32x32xbf16>
    %cst_28 = arith.constant dense<0.000000e+00> : vector<2x32xf32>
    %41 = tpu.matmul %39, %40, %cst_28 {dimension_numbers = #tpu.dot_dimension_numbers<[1], [0], [0], [1], [0, 0, 1, 1], [], []>} : vector<2x32xbf16>, vector<32x32xbf16>, vector<2x32xf32> -> vector<2x32xf32>
    %c0_29 = arith.constant 0 : index
    %c0_30 = arith.constant 0 : index
    %42 = vector.load %arg10[%c0_29, %c0_30] : memref<2x32xf32, #tpu.memory_space<vmem>>, vector<2x32xf32>
    tpu.vector_store %arg10[%c0_29, %c0_30], %41 {strides = array<i32>} : memref<2x32xf32, #tpu.memory_space<vmem>>, vector<2x32xf32>,
    return
  }
}

</mosaic_0001>

<bundles_post_ra>
// kernel: mha_forward.1
= control target key start
LH: loop header
LB: loop body
LE: loop exit
PB: predicated region body
PF: predicated region fallthrough
CT: control target
= control target key end

     0   :  { %s769_s0 = inlined_call_operand.vmem [shape: s32[1,2,1], index: 0, kind: input, shape index: {}]   ;;  %s770_s1 = inlined_call_operand.vmem [shape: bf16[2,32], index: 1, kind: input, shape index: {}]   ;;  %s771_s2 = inlined_call_operand.vmem [shape: bf16[16,32], index: 2, kind: input, shape index: {}]   ;;  %s772_s3 = inlined_call_operand.vmem [shape: bf16[16,32], index: 3, kind: input, shape index: {}]   ;;  %s773_s4 = inlined_call_operand.vmem [shape: bf16[32,32], index: 4, kind: input, shape index: {}]   ;;  %s774_s5 = inlined_call_operand.vmem [shape: bf16[32,32], index: 5, kind: input, shape index: {}]   ;;  %s775_s6 = inlined_call_operand.vmem [shape: bf16[32,32], index: 6, kind: input, shape index: {}]   ;;  %s776_s7 = inlined_call_operand.vmem [shape: bf16[32,32], index: 7, kind: input, shape index: {}]   ;;  %s777_s8 = inlined_call_operand.vmem [shape: f32[32,4], index: 8, kind: input, shape index: {}]   ;;  %s778_s9 = inlined_call_operand.vmem [shape: bf16[4,32], index: 9, kind: input, shape index: {}]   ;;  %s779_s10 = inlined_call_operand.hbm [shape: f32[2,32], index: 10, kind: output, shape index: {}]  }
   0x1   :  { %v568_v0 = vld [vmem:[%s773_s4 + $0x8] sm:$0xff]  ;;  %v567_v2 = vld [vmem:[%s773_s4] sm:$0xff] }
   0x2   :  { %v571_v1 = vld [vmem:[%s774_s5 + $0x8] sm:$0xff]  ;;  %64 = vmatpush.bf16.msra.mxu0 %v568_v0  ;;  %v570_v3 = vld [vmem:[%s774_s5] sm:$0xff] }
   0x3   :  { %103 = vmatpush.bf16.msra.mxu1 %v571_v1 }
   0x4   :  { %15 = vsyncpa [#allocation3], 0  ;;  %v569_v4 = vld [vmem:[%s771_s2] sm:$0xff]  ;;  %vm54_vm0 = vcmask 261120   ;;  %v190_v7 = vld [vmem:[%s777_s8 + $0x18] sm:$0xff]  ;;  %v626_v8 = vmov 0  }
   0x5   :  { %v37_v5 = vld [vmem:[%s770_s1] sm:$0x1]  ;;  %580 = vset.pattern.permute.xlu1 %v626_v8  ;;  %579 = vset.pattern.permute.xlu0 %v626_v8  ;;  %v189_v11 = vld [vmem:[%s777_s8 + $0x10] sm:$0xff]  ;;  %v188_v12 = vld [vmem:[%s777_s8 + $0x8] sm:$0xff]  ;;  %vm314_vm14 = vcmask 25600   ;;  %s511_s21 = sshll.u32 %s779_s10, 4  ;;  %s512_s21 = int_to_ptr.hbm [resolvable:$true] %s511_s21 }
   0x6   :  { %65 = vmatpush.bf16.msra.mxu0 %v567_v2  ;;  %v257_v6 = vld [vmem:[%s769_s0] sm:$0x3]  ;;  %232 = vmatpush.msra.mxu3 %v190_v7 }
   0x7   :  { %104 = vmatpush.bf16.msra.mxu1 %v570_v3  ;;  %vm260_vm1 = vcmp.gt.s32.totalorder %v257_v6, 2  ;;  %vm258_vm2 = vcmp.gt.s32.totalorder %v257_v6, 0  ;;  %581 = vset.pattern.permute.xlu2 %v626_v8  ;;  %v187_v13 = vld [vmem:[%s777_s8] sm:$0xff]  ;;  %vm261_vm3 = vcmp.gt.s32.totalorder %v257_v6, 3  ;;  %vm259_vm4 = vcmp.gt.s32.totalorder %v257_v6, 1 }
   0x8   :  { %v268_v9 = vsel %vm260_vm1, 1, %v626_v8  ;;  %v266_v10 = vsel %vm258_vm2, 1, %v626_v8  ;;  %233 = vmatpush.msra.mxu3 %v189_v11  ;;  %v269_v14 = vsel %vm261_vm3, 1, %v626_v8  ;;  %v267_v15 = vsel %vm259_vm4, 1, %v626_v8 }
   0x9   :  { %528 = vmatmul.msk.bf16.vlgmr.msra.gmra.mxu0 %vm54_vm0, %v37_v5  ;;  %281 = vperm.xlu1 %580, %v268_v9   ;;  %vm265_vm5 = vcmp.gt.s32.totalorder %v257_v6, 7  ;;  %vm264_vm6 = vcmp.gt.s32.totalorder %v257_v6, 6  ;;  %vm262_vm7 = vcmp.gt.s32.totalorder %v257_v6, 4  ;;  %vm263_vm8 = vcmp.gt.s32.totalorder %v257_v6, 5 }
   0xa   :  { %541 = vmatmul.msk.bf16.vlgmr.msra.gmra.mxu1 %vm54_vm0, %v569_v4  ;;  %275 = vperm.xlu0 %579, %v266_v10   ;;  %v273_v16 = vsel %vm265_vm5, 1, %v626_v8  ;;  %v272_v17 = vsel %vm264_vm6, 1, %v626_v8  ;;  %v270_v18 = vsel %vm262_vm7, 1, %v626_v8  ;;  %v271_v19 = vsel %vm263_vm8, 1, %v626_v8 }
   0xb   :  { %234 = vmatpush.msra.mxu3 %v188_v12  ;;  %287 = vperm.xlu2 %581, %v270_v18   ;;  %vm414_vm3 = vcmask 1041408   ;;  %vm411_vm4 = vcmask 31744   ;;  %vm454_vm5 = vcmask 254976  }
   0xd   :  { %235 = vmatpush.msra.mxu3 %v187_v13 }
  0x11   :  { %284 = vperm.xlu1 %580, %v269_v14  }
  0x12   :  { %278 = vperm.xlu0 %579, %v267_v15   ;;  %v574_v15 = vld [vmem:[%s775_s6 + $0x8] sm:$0xff] }
  0x13   :  { %290 = vperm.xlu2 %581, %v271_v19   ;;  %143 = vmatpush.bf16.msra.mxu2 %v574_v15 }
  0x19   :  { %296 = vperm.xlu1 %580, %v273_v16  }
  0x1a   :  { %293 = vperm.xlu0 %579, %v272_v17  }
  0x65   :  { %v288_v44 = vpop.permute.xlu2 %287 }
  0x66   :  { %vm302_vm10 = vcmp.eq.s32.totalorder %v288_v44, 1 }
  0x6d   :  { %v291_v51 = vpop.permute.xlu2 %290 }
  0x6e   :  { %vm303_vm2 = vcmp.eq.s32.totalorder %v291_v51, 1 }
  0x7b   :  { %v282_v40 = vpop.permute.xlu1 %281 }
  0x7c   :  { %v276_v41 = vpop.permute.xlu0 %275  ;;  %vm300_vm9 = vcmp.eq.s32.totalorder %v282_v40, 1 }
  0x7d   :  { %vm298_vm11 = vcmp.eq.s32.totalorder %v276_v41, 1  ;;  %v386_v41 = vld [vmem:[%s778_s9] sm:$0x3] }
  0x83   :  { %v285_v42 = vpop.permute.xlu1 %284 }
  0x84   :  { %v279_v43 = vpop.permute.xlu0 %278  ;;  %vm301_vm12 = vcmp.eq.s32.totalorder %v285_v42, 1 }
  0x85   :  { %vm299_vm13 = vcmp.eq.s32.totalorder %v279_v43, 1  ;;  %v416_v43 = vsel %vm414_vm3, %v386_v41, 0 }
  0x86   :  { %v67_v20 = vpop.f32.mrf.mxu0  ;;  %425 = vmatpush.bf16.msrb.mxu0 %v416_v43 }
  0x87   :  { %v106_v21 = vpop.f32.mrf.mxu1 }
  0x88   :  { %v153_v22 = vrot.slane %v106_v21, 2  ;;  %v154_v23 = vrot.slane %v106_v21, 4  ;;  %v155_v24 = vrot.slane %v106_v21, 6  ;;  %v179_v25 = vmul.f32 %v106_v21, %v67_v20 }
  0x8a   :  { %v180_v26 = vmul.f32 %v153_v22, %v67_v20  ;;  %v181_v27 = vmul.f32 %v154_v23, %v67_v20  ;;  %v182_v28 = vmul.f32 %v155_v24, %v67_v20  ;;  %199 = vst [vmem:[#allocation1] ss:$4 sm:$0xff] %v179_v25 }
  0x8b   :  { %v297_v48 = vpop.permute.xlu1 %296 }
  0x8c   :  { %201 = vst [vmem:[#allocation1 + $0x1] ss:$4 sm:$0xff] %v180_v26  ;;  %v294_v50 = vpop.permute.xlu0 %293  ;;  %vm305_vm15 = vcmp.eq.s32.totalorder %v297_v48, 1  ;;  %v573_v26 = vld [vmem:[%s775_s6] sm:$0xff] }
  0x8d   :  { %203 = vst [vmem:[#allocation1 + $0x2] ss:$4 sm:$0xff] %v181_v27  ;;  %vm304_vm1 = vcmp.eq.s32.totalorder %v294_v50, 1  ;;  %144 = vmatpush.bf16.msra.mxu2 %v573_v26 }
  0x8e   :  { %205 = vst [vmem:[#allocation1 + $0x3] ss:$4 sm:$0xff] %v182_v28  ;;  %v69_v29 = vpop.f32.mrf.mxu0 }
  0x8f   :  { %v108_v30 = vpop.f32.mrf.mxu1  ;;  %v572_v29 = vld [vmem:[%s772_s3] sm:$0xff] }
  0x90   :  { %v156_v31 = vrot.slane %v108_v30, 2  ;;  %v157_v32 = vrot.slane %v108_v30, 4  ;;  %v158_v33 = vrot.slane %v108_v30, 6  ;;  %v183_v34 = vmul.f32 %v108_v30, %v67_v20  ;;  %554 = vmatmul.msk.bf16.vlgmr.msra.gmra.mxu2 %vm54_vm0, %v572_v29 }
  0x92   :  { %v184_v35 = vmul.f32 %v156_v31, %v67_v20  ;;  %v185_v36 = vmul.f32 %v157_v32, %v67_v20  ;;  %v186_v37 = vmul.f32 %v158_v33, %v67_v20  ;;  %207 = vst [vmem:[#allocation1 + $0x20] ss:$4 sm:$0xff] %v183_v34 }
  0x94   :  { %209 = vst [vmem:[#allocation1 + $0x21] ss:$4 sm:$0xff] %v184_v35 }
  0x95   :  { %211 = vst [vmem:[#allocation1 + $0x22] ss:$4 sm:$0xff] %v185_v36  ;;  %v214_v38 = vld.sshfl [vmem:[#allocation1] sm:$0xff pattern:$0x73625140] }
  0x96   :  { %213 = vst [vmem:[#allocation1 + $0x23] ss:$4 sm:$0xff] %v186_v37  ;;  %555 = vmatmul.msk.f32.vlgmr.msra.gmra.mxu3 %vm54_vm0, %v214_v38 }
  0x9d   :  { %v215_v39 = vld.sshfl [vmem:[#allocation1 + $0x20] sm:$0xff pattern:$0x73625140] }
  0x9e   :  { %556 = vmatmul.msk.f32.gmra.mxu3 %vm54_vm0, %v215_v39 }
 0x113   :  { %v146_v15 = vpop.f32.mrf.mxu2 }
 0x119   :  { %v237_v45 = vpop.f32.mrf.mxu3 }
 0x11a   :  { %v245_v46 = vrot.slane %v237_v45, 2  ;;  %v246_v47 = vrot.slane %v237_v45, 4  ;;  %v247_v49 = vrot.slane %v237_v45, 6  ;;  %v306_v52 = vsel %vm298_vm11, %v237_v45, -1e+30 }
 0x11b   :  { %v315_v61 = vsel %vm314_vm14, %v306_v52, -inf }
 0x11c   :  { %v307_v53 = vsel %vm299_vm13, %v245_v46, -1e+30  ;;  %v308_v54 = vsel %vm300_vm9, %v246_v47, -1e+30  ;;  %v309_v55 = vsel %vm301_vm12, %v247_v49, -1e+30 }
 0x11d   :  { %v316_v62 = vsel %vm314_vm14, %v307_v53, -inf  ;;  %v317_v63 = vsel %vm314_vm14, %v308_v54, -inf  ;;  %v318_v4 = vsel %vm314_vm14, %v309_v55, -inf }
 0x121   :  { %v240_v56 = vpop.f32.mrf.mxu3 }
 0x122   :  { %v248_v57 = vrot.slane %v240_v56, 2  ;;  %v249_v58 = vrot.slane %v240_v56, 4  ;;  %v250_v59 = vrot.slane %v240_v56, 6  ;;  %v310_v60 = vsel %vm302_vm10, %v240_v56, -1e+30 }
 0x123   :  { %v319_v0 = vsel %vm314_vm14, %v310_v60, -inf }
 0x124   :  { %v311_v1 = vsel %vm303_vm2, %v248_v57, -1e+30  ;;  %v312_v2 = vsel %vm304_vm1, %v249_v58, -1e+30  ;;  %v313_v3 = vsel %vm305_vm15, %v250_v59, -1e+30  ;;  %v320_v8 = vmax.f32 %v315_v61, %v319_v0 }
 0x125   :  { %v321_v5 = vsel %vm314_vm14, %v311_v1, -inf  ;;  %v323_v6 = vsel %vm314_vm14, %v312_v2, -inf  ;;  %v325_v7 = vsel %vm314_vm14, %v313_v3, -inf }
 0x126   :  { %v322_v9 = vmax.f32 %v316_v62, %v321_v5  ;;  %v324_v10 = vmax.f32 %v317_v63, %v323_v6  ;;  %v326_v11 = vmax.f32 %v318_v4, %v325_v7 }
 0x128   :  { %v327_v12 = vmax.f32 %v320_v8, %v322_v9  ;;  %v328_v13 = vmax.f32 %v324_v10, %v326_v11 }
 0x12a   :  { %v329_v14 = vmax.f32 %v327_v12, %v328_v13  ;;  %v576_v13 = vld [vmem:[%s776_s7 + $0x8] sm:$0xff] }
 0x12b   :  { %496 = vmatpush.bf16.msrb.mxu1 %v576_v13 }
 0x12c   :  { %v330_v16 = vsub.f32 %v306_v52, %v329_v14  ;;  %v331_v17 = vsub.f32 %v307_v53, %v329_v14  ;;  %v332_v18 = vsub.f32 %v308_v54, %v329_v14  ;;  %v333_v19 = vsub.f32 %v309_v55, %v329_v14 }
 0x12d   :  { %v334_v20 = vsub.f32 %v310_v60, %v329_v14  ;;  %v335_v24 = vsub.f32 %v311_v1, %v329_v14  ;;  %v336_v27 = vsub.f32 %v312_v2, %v329_v14  ;;  %v337_v30 = vsub.f32 %v313_v3, %v329_v14  ;;  %v575_v14 = vld [vmem:[%s776_s7] sm:$0xff]  ;;  %s627_s7 = smov [#allocation2]  }
 0x12e   :  { %v338_v21 = vmul.f32 1.442695, %v330_v16  ;;  %v340_v22 = vmul.f32 1.442695, %v331_v17  ;;  %v342_v23 = vmul.f32 1.442695, %v332_v18 }
 0x12f   :  { %v344_v25 = vmul.f32 1.442695, %v333_v19  ;;  %v346_v28 = vmul.f32 1.442695, %v334_v20  ;;  %v348_v31 = vmul.f32 1.442695, %v335_v24  ;;  %497 = vmatpush.bf16.msrb.mxu1 %v575_v14 }
 0x130   :  { %582 = vpow2.f32 %v338_v21  ;;  %v350_v32 = vmul.f32 1.442695, %v336_v27  ;;  %v352_v35 = vmul.f32 1.442695, %v337_v30  ;;  %v167_v16 = vrot.slane %v146_v15, 2  ;;  %v148_v27 = vpop.f32.mrf.mxu2  ;;  %s509_s18 = sshll.u32 %s627_s7, 4  ;;  %s510_s18 = int_to_ptr.vmem [resolvable:$true] %s509_s18 }
 0x131   :  { %584 = vpow2.f32 %v340_v22  ;;  %v168_v17 = vrot.slane %v146_v15, 4  ;;  %v169_v18 = vrot.slane %v146_v15, 6 }
 0x132   :  { %586 = vpow2.f32 %v342_v23 }
 0x133   :  { %588 = vpow2.f32 %v344_v25 }
 0x134   :  { %590 = vpow2.f32 %v346_v28 }
 0x135   :  { %592 = vpow2.f32 %v348_v31 }
 0x136   :  { %v583_v33 = vpop.eup %582  ;;  %594 = vpow2.f32 %v350_v32  ;;  %v170_v32 = vrot.slane %v148_v27, 2 }
 0x137   :  { %v585_v34 = vpop.eup %584  ;;  %v354_v36 = vsel %vm314_vm14, %v583_v33, 0.0  ;;  %596 = vpow2.f32 %v352_v35 }
 0x138   :  { %v587_v37 = vpop.eup %586  ;;  %v355_v38 = vsel %vm314_vm14, %v585_v34, 0.0 }
 0x139   :  { %v589_v39 = vpop.eup %588  ;;  %v356_v40 = vadd.f32 %v355_v38, %v354_v36  ;;  %v357_v42 = vsel %vm314_vm14, %v587_v37, 0.0 }
 0x13a   :  { %v591_v44 = vpop.eup %590  ;;  %v359_v46 = vsel %vm314_vm14, %v589_v39, 0.0 }
 0x13b   :  { %v358_v45 = vadd.f32 %v357_v42, %v356_v40  ;;  %v593_v47 = vpop.eup %592  ;;  %v361_v49 = vsel %vm314_vm14, %v591_v44, 0.0  ;;  %v172_v42 = vrot.slane %v148_v27, 6 }
 0x13c   :  { %v595_v50 = vpop.eup %594  ;;  %v363_v52 = vsel %vm314_vm14, %v593_v47, 0.0 }
 0x13d   :  { %v360_v48 = vadd.f32 %v359_v46, %v358_v45  ;;  %v597_v53 = vpop.eup %596  ;;  %v365_v55 = vsel %vm314_vm14, %v595_v50, 0.0 }
 0x13e   :  { %v367_v57 = vsel %vm314_vm14, %v597_v53, 0.0 }
 0x13f   :  { %v362_v51 = vadd.f32 %v361_v49, %v360_v48 }
 0x141   :  { %v364_v54 = vadd.f32 %v363_v52, %v362_v51 }
 0x143   :  { %v366_v56 = vadd.f32 %v365_v55, %v364_v54 }
 0x145   :  { %v368_v58 = vadd.f32 %v367_v57, %v366_v56 }
 0x147   :  { %598 = vrcp.f32 %v368_v58 }
 0x14d   :  { %v599_v59 = vpop.eup %598 }
 0x14e   :  { %v370_v60 = vmul.f32 %v599_v59, %v583_v33  ;;  %v371_v61 = vmul.f32 %v599_v59, %v585_v34  ;;  %v372_v62 = vmul.f32 %v599_v59, %v587_v37  ;;  %v373_v63 = vmul.f32 %v599_v59, %v589_v39 }
 0x14f   :  { %v374_v0 = vmul.f32 %v599_v59, %v591_v44  ;;  %v375_v1 = vmul.f32 %v599_v59, %v593_v47  ;;  %v376_v2 = vmul.f32 %v599_v59, %v595_v50  ;;  %v377_v6 = vmul.f32 %v599_v59, %v597_v53 }
 0x150   :  { %v378_v3 = vpack.c.bf16 %v370_v60, %v370_v60  ;;  %v379_v4 = vpack.c.bf16 %v371_v61, %v371_v61  ;;  %v380_v5 = vpack.c.bf16 %v372_v62, %v372_v62  ;;  %v381_v7 = vpack.c.bf16 %v373_v63, %v373_v63 }
 0x151   :  { %v382_v8 = vpack.c.bf16 %v374_v0, %v374_v0  ;;  %v383_v9 = vpack.c.bf16 %v375_v1, %v375_v1  ;;  %v384_v10 = vpack.c.bf16 %v376_v2, %v376_v2  ;;  %v385_v11 = vpack.c.bf16 %v377_v6, %v377_v6 }
 0x152   :  { %388 = vst [vmem:[#allocation1] ss:$9 sm:$0xff] %v378_v3  ;;  %v171_v33 = vrot.slane %v148_v27, 4 }
 0x153   :  { %391 = vst [vmem:[#allocation1 + $0x1] ss:$9 sm:$0xff] %v379_v4 }
 0x154   :  { %394 = vst [vmem:[#allocation1 + $0x2] ss:$9 sm:$0xff] %v380_v5 }
 0x155   :  { %397 = vst [vmem:[#allocation1 + $0x3] ss:$9 sm:$0xff] %v381_v7 }
 0x156   :  { %400 = vst [vmem:[#allocation1 + $0x4] ss:$9 sm:$0xff] %v382_v8 }
 0x157   :  { %403 = vst [vmem:[#allocation1 + $0x5] ss:$9 sm:$0xff] %v383_v9 }
 0x158   :  { %406 = vst [vmem:[#allocation1 + $0x6] ss:$9 sm:$0xff] %v384_v10 }
 0x159   :  { %409 = vst [vmem:[#allocation1 + $0x7] ss:$9 sm:$0xff] %v385_v11 }
 0x160   :  { %v410_v12 = vld [vmem:[#allocation1] sm:$0xff] }
 0x161   :  { %557 = vmatmul.msk.bf16.vlgmr.msrb.gmra.mxu0 %vm411_vm4, %v410_v12 }
 0x1de   :  { %v427_v19 = vpop.f32.mrf.mxu0 }
 0x1df   :  { %v434_v20 = vrot.slane %v427_v19, 2  ;;  %v435_v21 = vrot.slane %v427_v19, 4  ;;  %v436_v22 = vrot.slane %v427_v19, 6  ;;  %v446_v23 = vmul.f32 %v427_v19, %v146_v15 }
 0x1e1   :  { %v447_v24 = vmul.f32 %v434_v20, %v167_v16  ;;  %v448_v25 = vmul.f32 %v435_v21, %v168_v17  ;;  %v449_v26 = vmul.f32 %v436_v22, %v169_v18  ;;  %v455_v28 = vsel %vm454_vm5, %v446_v23, 0.0 }
 0x1e3   :  { %v456_v29 = vsel %vm454_vm5, %v447_v24, 0.0  ;;  %v458_v31 = vsel %vm454_vm5, %v448_v25, 0.0  ;;  %v460_v36 = vsel %vm454_vm5, %v449_v26, 0.0 }
 0x1e4   :  { %v457_v30 = vadd.f32 %v456_v29, %v455_v28 }
 0x1e6   :  { %v429_v34 = vpop.f32.mrf.mxu0  ;;  %v459_v35 = vadd.f32 %v458_v31, %v457_v30 }
 0x1e7   :  { %v437_v37 = vrot.slane %v429_v34, 2  ;;  %v438_v38 = vrot.slane %v429_v34, 4  ;;  %v439_v39 = vrot.slane %v429_v34, 6  ;;  %v450_v40 = vmul.f32 %v429_v34, %v148_v27 }
 0x1e8   :  { %v461_v41 = vadd.f32 %v460_v36, %v459_v35 }
 0x1e9   :  { %v451_v43 = vmul.f32 %v437_v37, %v170_v32  ;;  %v452_v44 = vmul.f32 %v438_v38, %v171_v33  ;;  %v462_v45 = vsel %vm454_vm5, %v450_v40, 0.0  ;;  %v453_v47 = vmul.f32 %v439_v39, %v172_v42 }
 0x1ea   :  { %v463_v46 = vadd.f32 %v462_v45, %v461_v41 }
 0x1eb   :  { %v464_v48 = vsel %vm454_vm5, %v451_v43, 0.0  ;;  %v466_v50 = vsel %vm454_vm5, %v452_v44, 0.0  ;;  %v468_v52 = vsel %vm454_vm5, %v453_v47, 0.0 }
 0x1ec   :  { %v465_v49 = vadd.f32 %v464_v48, %v463_v46 }
 0x1ee   :  { %v467_v51 = vadd.f32 %v466_v50, %v465_v49 }
 0x1f0   :  { %v469_v53 = vadd.f32 %v468_v52, %v467_v51 }
 0x1f2   :  { %v470_v54 = vpack.c.bf16 %v469_v53, %v469_v53 }
 0x1f4   :  { %566 = vmatmul.msk.bf16.vlgmr.msrb.gmra.mxu1 %vm54_vm0, %v470_v54 }
 0x271   :  { %v499_v55 = vpop.f32.mrf.mxu1 }
 0x272   :  { %503 = vst.msk [vmem:[#allocation2] sm:$0x3] %vm454_vm5, %v499_v55 }
 0x273   :  { %514 = dma.vmem_to_hbm [thread:$0]  %s510_s18, 32, %s512_s21, [#allocation3]  }
 0x279   :  { %v501_v56 = vpop.f32.mrf.mxu1 }
 0x27a   :  { %624 = dma.done.wait [#allocation3], 32  }
 0x27b   :  { %625 = vsyncadd [#allocation3], 4294967264 }
 0x27c   :  { %519 = vsyncpa [#allocation3], 1 }

</bundles_post_ra>
